<compile_context>
chip_gen: v5e
topology: v5e:2x2
jax: 0.10.0
libtpu: 0.0.40
codegen_flags: <defaults>
</compile_context>

<pallas_src>
from functools import partial

import jax
import jax.numpy as jnp
from jax.experimental import pallas as pl
from jax.experimental.pallas import tpu as pltpu


def _patch_expand_kernel(x_ref, wt_ref, b_ref, gamma_ref, beta_ref,
                         red_ref, exp_ref, o_ref, *, eps):
    """Fused Linear + grouped LayerNorm on one channel-major (C, tile_p) tile.

    x_ref     : (C, tile_p)        NCHW-native activation tile (io dtype)
    wt_ref    : (c_exp, C)         Linear weight, torch layout (io dtype)
    b_ref     : (c_exp, 1)         Linear bias (f32)
    gamma_ref : (c_exp, 1)         LN weight, pre-tiled over hw^2 groups (f32)
    beta_ref  : (c_exp, 1)         LN bias,   pre-tiled over hw^2 groups (f32)
    red_ref   : (groups, c_exp)    per-group reducer: 1/c_out on own group, else 0 (f32)
    exp_ref   : (c_exp, groups)    per-group expander: 1 on own group, else 0 (f32)
    o_ref     : (c_exp, tile_p)    output tile (io dtype), pixels on lanes
    """
    x = x_ref[...]
    # Linear (channel-major): y[j, p] = sum_k Wt[j, k] * x[k, p] + b[j].
    y = jnp.dot(wt_ref[...], x, preferred_element_type=jnp.float32) + b_ref[...]

    # Grouped LayerNorm, lane-dense: per-group mean/variance via factorized
    # reduce (groups x c_exp) / expand (c_exp x groups) matmuls.  Both ride the
    # otherwise-idle MXU; everything stays (c_exp, tile_p) full-lane-width and
    # all statistics stay f32.
    red = red_ref[...]
    ex = exp_ref[...]
    mean = jnp.dot(ex, jnp.dot(red, y, preferred_element_type=jnp.float32),
                   preferred_element_type=jnp.float32)
    d = y - mean
    var = jnp.dot(ex, jnp.dot(red, d * d, preferred_element_type=jnp.float32),
                  preferred_element_type=jnp.float32)
    yn = d * jax.lax.rsqrt(var + eps)
    o_ref[...] = (yn * gamma_ref[...] + beta_ref[...]).astype(o_ref.dtype)


def patch_expand(x_nchw, w, b, gamma, beta, *, scale, hw_scale, eps=1e-5,
                 tile_p=512, io_dtype=None, out_layout="NCHW"):
    """Pallas implementation of PatchExpand.forward.

    x_nchw : (B, C, H, W)
    w      : (C, C*scale)    (torch weight transposed: weight.T)
    b      : (C*scale,)
    gamma  : (c_out,)  LayerNorm weight,  c_out = C*scale // hw_scale**2
    beta   : (c_out,)  LayerNorm bias
    io_dtype   : optional dtype for HBM-facing activations/weight/output (e.g. bf16)
    out_layout : "NCHW" (module semantics) or "NHWC" (alternate layout)
    returns: (B, c_out, H*hw_scale, W*hw_scale) for NCHW.
    """
    B, C, H, W = x_nchw.shape
    c_exp = C * scale
    groups = hw_scale * hw_scale
    c_out = c_exp // groups
    assert c_out * groups == c_exp

    io_dtype = jnp.dtype(io_dtype) if io_dtype is not None else x_nchw.dtype

    # NCHW kept as-is: flattening (H, W) -> HW is a free view (minor dims contiguous).
    HW = H * W
    x3 = x_nchw.astype(io_dtype).reshape(B, C, HW)

    # Pixel (lane) tile size: full extent when small, else a multiple of 128 so the
    # big output store stays unmasked / lane-dense.  Boundary tiles are masked by
    # the Pallas pipeline (per-lane independent math, so padded lanes are harmless).
    tile_p = int(tile_p)
    if HW <= max(tile_p, 128):
        tile_p = HW
    else:
        tile_p = max(128, (min(tile_p, HW) // 128) * 128)
    n_tiles = pl.cdiv(HW, tile_p)

    # Small per-channel parameters (f32; LN statistics stay f32 in-kernel).
    wt = jnp.transpose(w).astype(io_dtype)                      # (c_exp, C)
    b_col = b.astype(jnp.float32).reshape(c_exp, 1)
    gamma_col = jnp.tile(gamma.astype(jnp.float32), groups).reshape(c_exp, 1)
    beta_col = jnp.tile(beta.astype(jnp.float32), groups).reshape(c_exp, 1)
    gidx = jnp.arange(c_exp, dtype=jnp.int32) // c_out
    onehot = (jnp.arange(groups, dtype=jnp.int32)[:, None] == gidx[None, :])
    red = onehot.astype(jnp.float32) / float(c_out)             # (groups, c_exp)
    ex = jnp.transpose(onehot).astype(jnp.float32)              # (c_exp, groups)

    # Grid-invariant operands: fetched once, single-buffered.
    def _const_spec(shape):
        return pl.BlockSpec(shape, lambda bi, pi: (0,) * len(shape),
                            pipeline_mode=pl.Buffered(1))

    # Explicit VMEM budget: double-buffered x/out tiles, single-buffered constants,
    # plus f32 intermediate headroom; clamped safely below v7x's 64 MiB VMEM.
    io_bytes = jnp.dtype(io_dtype).itemsize
    vmem_need = (2 * C * tile_p * io_bytes                      # x double-buffer
                 + 2 * c_exp * tile_p * io_bytes                # out double-buffer
                 + c_exp * C * io_bytes                         # weight
                 + (3 * c_exp + 2 * groups * c_exp) * 4         # small constants
                 + 4 * c_exp * tile_p * 4)                      # f32 intermediates
    vmem_limit = int(min(max(2 * vmem_need, 16 * 2**20), 48 * 2**20))

    out3 = pl.pallas_call(
        partial(_patch_expand_kernel, eps=eps),
        out_shape=jax.ShapeDtypeStruct((B, c_exp, HW), io_dtype),
        grid_spec=pltpu.PrefetchScalarGridSpec(
            num_scalar_prefetch=0,
            grid=(B, n_tiles),
            in_specs=[
                pl.BlockSpec((None, C, tile_p), lambda bi, pi: (bi, 0, pi)),  # x
                _const_spec((c_exp, C)),        # weight (torch layout)
                _const_spec((c_exp, 1)),        # bias
                _const_spec((c_exp, 1)),        # LN gamma (tiled over groups)
                _const_spec((c_exp, 1)),        # LN beta  (tiled over groups)
                _const_spec((groups, c_exp)),   # group reducer (1/c_out)
                _const_spec((c_exp, groups)),   # group expander (0/1)
            ],
            out_specs=pl.BlockSpec((None, c_exp, tile_p),
                                   lambda bi, pi: (bi, 0, pi)),
        ),
        compiler_params=pltpu.CompilerParams(
            dimension_semantics=("parallel", "parallel"),
            vmem_limit_bytes=vmem_limit),
    )(x3, wt, b_col, gamma_col, beta_col, red, ex)

    # Pixel-shuffle + layout: a single fused XLA transpose (pure layout, one pass).
    # TODO(synk): fully fusing this rearrange into out_specs would require an
    # in-kernel lane<->sublane interleave (stride-hw upsample); kept outside to
    # preserve unmasked full-lane-width stores of the (c_exp, tile_p) result.
    y6 = out3.reshape(B, hw_scale, hw_scale, c_out, H, W)      # (b, p1, p2, c, h, w)
    if out_layout == "NHWC":
        return jnp.transpose(y6, (0, 4, 1, 5, 2, 3)).reshape(
            B, H * hw_scale, W * hw_scale, c_out)
    y = jnp.transpose(y6, (0, 3, 4, 1, 5, 2))                  # (b, c, h, p1, w, p2)
    return y.reshape(B, c_out, H * hw_scale, W * hw_scale)


def _reference(x_nchw, w, b, gamma, beta, *, scale, hw_scale, eps=1e-5):
    """Pure-JAX reference matching the PyTorch forward exactly."""
    B, C, H, W = x_nchw.shape
    c_exp = C * scale
    c_out = c_exp // hw_scale ** 2
    xnew = jnp.transpose(x_nchw, (0, 2, 3, 1)).reshape(B, H * W, C)
    xnew = xnew @ w + b
    xnew = xnew.reshape(B, H, W, hw_scale, hw_scale, c_out)
    xnew = jnp.transpose(xnew, (0, 1, 3, 2, 4, 5))
    xnew = xnew.reshape(B, H * hw_scale, W * hw_scale, c_out)
    mean = jnp.mean(xnew, axis=-1, keepdims=True)
    var = jnp.mean(jnp.square(xnew - mean), axis=-1, keepdims=True)
    xn = (xnew - mean) / jnp.sqrt(var + eps) * gamma + beta
    return jnp.transpose(xn, (0, 3, 1, 2))


if __name__ == "__main__":
    # Module config (small, consistent with forward):
    scale, hw_scale, channel = 4, 2, 32
    B, H, W = 2, 8, 8
    c_exp = channel * scale                 # 128
    c_out = c_exp // hw_scale ** 2          # 32

    key = jax.random.PRNGKey(0)
    kx, kw, kb, kg, kbt = jax.random.split(key, 5)

    x = jax.random.normal(kx, (B, channel, H, W), dtype=jnp.float32)
    # Deterministic synthetic parameters (shapes per nn.Linear / nn.LayerNorm).
    w = jax.random.normal(kw, (channel, c_exp), dtype=jnp.float32) * 0.05
    b = jax.random.normal(kb, (c_exp,), dtype=jnp.float32) * 0.05
    gamma = 1.0 + 0.1 * jax.random.normal(kg, (c_out,), dtype=jnp.float32)
    beta = 0.1 * jax.random.normal(kbt, (c_out,), dtype=jnp.float32)

    ref = _reference(x, w, b, gamma, beta, scale=scale, hw_scale=hw_scale)

    # Default f32 I/O path (matches the PyTorch module numerics).  Tolerance allows
    # for MXU pass-decomposition of the in-kernel f32 matmuls used for LN stats.
    out = patch_expand(x, w, b, gamma, beta, scale=scale, hw_scale=hw_scale)
    out = jax.block_until_ready(out)
    assert out.shape == (B, c_out, H * hw_scale, W * hw_scale), out.shape
    assert jnp.allclose(out, ref, rtol=5e-3, atol=5e-3), float(
        jnp.max(jnp.abs(out - ref)))

    # bf16 HBM I/O path (halves HBM traffic on this memory-bound op); accumulation
    # and LayerNorm statistics remain f32 in-kernel, so only I/O precision changes.
    out_bf16 = patch_expand(x, w, b, gamma, beta, scale=scale,
                            hw_scale=hw_scale, io_dtype=jnp.bfloat16)
    out_bf16 = jax.block_until_ready(out_bf16)
    assert out_bf16.shape == (B, c_out, H * hw_scale, W * hw_scale)
    assert float(jnp.max(jnp.abs(out_bf16.astype(jnp.float32) - ref))) < 0.15

    # NHWC output mode (skips nothing semantically, alternate final layout).
    out_nhwc = patch_expand(x, w, b, gamma, beta, scale=scale,
                            hw_scale=hw_scale, out_layout="NHWC")
    out_nhwc = jax.block_until_ready(out_nhwc)
    assert jnp.allclose(jnp.transpose(out_nhwc, (0, 3, 1, 2)), ref,
                        rtol=5e-3, atol=5e-3)

    print("KERNEL_OK")
</pallas_src>

<mosaic_0001>
module attributes {stable_mosaic.version = 11 : i64} {
  func.func @_patch_expand_kernel(%arg0: i32, %arg1: i32, %arg2: memref<1x32x64xf32, #tpu.memory_space<vmem>>, %arg3: memref<128x32xf32, #tpu.memory_space<vmem>>, %arg4: memref<128x1xf32, #tpu.memory_space<vmem>>, %arg5: memref<128x1xf32, #tpu.memory_space<vmem>>, %arg6: memref<128x1xf32, #tpu.memory_space<vmem>>, %arg7: memref<4x128xf32, #tpu.memory_space<vmem>>, %arg8: memref<128x4xf32, #tpu.memory_space<vmem>>, %arg9: memref<1x128x64xf32, #tpu.memory_space<vmem>>) attributes {dimension_semantics = [#tpu.dimension_semantics<parallel>, #tpu.dimension_semantics<parallel>], iteration_bounds = array<i64: 2, 1>, scalar_prefetch = 0 : i64, scratch_operands = 0 : i64, tpu.core_type = #tpu.core_type<tc>, window_params = [{transform_indices = @transform_0, window_bounds = array<i64: 1, 32, 64>}, {pipeline_mode = #tpu.pipeline_mode<synchronous>, transform_indices = @transform_1, window_bounds = array<i64: 128, 32>}, {pipeline_mode = #tpu.pipeline_mode<synchronous>, transform_indices = @transform_2, window_bounds = array<i64: 128, 1>}, {pipeline_mode = #tpu.pipeline_mode<synchronous>, transform_indices = @transform_3, window_bounds = array<i64: 128, 1>}, {pipeline_mode = #tpu.pipeline_mode<synchronous>, transform_indices = @transform_4, window_bounds = array<i64: 128, 1>}, {pipeline_mode = #tpu.pipeline_mode<synchronous>, transform_indices = @transform_5, window_bounds = array<i64: 4, 128>}, {pipeline_mode = #tpu.pipeline_mode<synchronous>, transform_indices = @transform_6, window_bounds = array<i64: 128, 4>}, {transform_indices = @transform_7, window_bounds = array<i64: 1, 128, 64>}]} {
    %c0 = arith.constant 0 : index
    %c0_0 = arith.constant 0 : index
    %c0_1 = arith.constant 0 : index
    %0 = vector.load %arg2[%c0, %c0_0, %c0_1] : memref<1x32x64xf32, #tpu.memory_space<vmem>>, vector<1x32x64xf32>
    %1 = vector.shape_cast %0 : vector<1x32x64xf32> to vector<32x64xf32>
    %c0_2 = arith.constant 0 : index
    %c0_3 = arith.constant 0 : index
    %2 = vector.load %arg3[%c0_2, %c0_3] : memref<128x32xf32, #tpu.memory_space<vmem>>, vector<128x32xf32>
    %cst = arith.constant dense<0.000000e+00> : vector<128x64xf32>
    %3 = tpu.matmul %2, %1, %cst {dimension_numbers = #tpu.dot_dimension_numbers<[1], [0], [0], [1], [0, 0, 1, 1], [], []>} : vector<128x32xf32>, vector<32x64xf32>, vector<128x64xf32> -> vector<128x64xf32>
    %c0_4 = arith.constant 0 : index
    %c0_5 = arith.constant 0 : index
    %4 = vector.load %arg4[%c0_4, %c0_5] : memref<128x1xf32, #tpu.memory_space<vmem>>, vector<128x1xf32>
    %5 = vector.broadcast %4 : vector<128x1xf32> to vector<128x64xf32>
    %6 = arith.addf %3, %5 : vector<128x64xf32>
    %c0_6 = arith.constant 0 : index
    %c0_7 = arith.constant 0 : index
    %7 = vector.load %arg7[%c0_6, %c0_7] : memref<4x128xf32, #tpu.memory_space<vmem>>, vector<4x128xf32>
    %c0_8 = arith.constant 0 : index
    %c0_9 = arith.constant 0 : index
    %8 = vector.load %arg8[%c0_8, %c0_9] : memref<128x4xf32, #tpu.memory_space<vmem>>, vector<128x4xf32>
    %cst_10 = arith.constant dense<0.000000e+00> : vector<4x64xf32>
    %9 = tpu.matmul %7, %6, %cst_10 {dimension_numbers = #tpu.dot_dimension_numbers<[1], [0], [0], [1], [0, 0, 1, 1], [], []>} : vector<4x128xf32>, vector<128x64xf32>, vector<4x64xf32> -> vector<4x64xf32>
    %cst_11 = arith.constant dense<0.000000e+00> : vector<128x64xf32>
    %10 = tpu.matmul %8, %9, %cst_11 {dimension_numbers = #tpu.dot_dimension_numbers<[1], [0], [0], [1], [0, 0, 1, 1], [], []>} : vector<128x4xf32>, vector<4x64xf32>, vector<128x64xf32> -> vector<128x64xf32>
    %11 = arith.subf %6, %10 : vector<128x64xf32>
    %12 = arith.mulf %11, %11 : vector<128x64xf32>
    %cst_12 = arith.constant dense<0.000000e+00> : vector<4x64xf32>
    %13 = tpu.matmul %7, %12, %cst_12 {dimension_numbers = #tpu.dot_dimension_numbers<[1], [0], [0], [1], [0, 0, 1, 1], [], []>} : vector<4x128xf32>, vector<128x64xf32>, vector<4x64xf32> -> vector<4x64xf32>
    %cst_13 = arith.constant dense<0.000000e+00> : vector<128x64xf32>
    %14 = tpu.matmul %8, %13, %cst_13 {dimension_numbers = #tpu.dot_dimension_numbers<[1], [0], [0], [1], [0, 0, 1, 1], [], []>} : vector<128x4xf32>, vector<4x64xf32>, vector<128x64xf32> -> vector<128x64xf32>
    %cst_14 = arith.constant 9.99999974E-6 : f32
    %15 = vector.broadcast %cst_14 : f32 to vector<128x64xf32>
    %16 = arith.addf %14, %15 : vector<128x64xf32>
    %17 = math.rsqrt %16 : vector<128x64xf32>
    %18 = arith.mulf %11, %17 : vector<128x64xf32>
    %c0_15 = arith.constant 0 : index
    %c0_16 = arith.constant 0 : index
    %19 = vector.load %arg5[%c0_15, %c0_16] : memref<128x1xf32, #tpu.memory_space<vmem>>, vector<128x1xf32>
    %20 = vector.broadcast %19 : vector<128x1xf32> to vector<128x64xf32>
    %21 = arith.mulf %18, %20 : vector<128x64xf32>
    %c0_17 = arith.constant 0 : index
    %c0_18 = arith.constant 0 : index
    %22 = vector.load %arg6[%c0_17, %c0_18] : memref<128x1xf32, #tpu.memory_space<vmem>>, vector<128x1xf32>
    %23 = vector.broadcast %22 : vector<128x1xf32> to vector<128x64xf32>
    %24 = arith.addf %21, %23 : vector<128x64xf32>
    %c0_19 = arith.constant 0 : index
    %c0_20 = arith.constant 0 : index
    %c0_21 = arith.constant 0 : index
    %25 = vector.load %arg9[%c0_19, %c0_20, %c0_21] : memref<1x128x64xf32, #tpu.memory_space<vmem>>, vector<1x128x64xf32>
    %26 = vector.shape_cast %25 : vector<1x128x64xf32> to vector<128x64xf32>
    %27 = vector.shape_cast %24 : vector<128x64xf32> to vector<1x128x64xf32>
    tpu.vector_store %arg9[%c0_19, %c0_20, %c0_21], %27 {strides = array<i32>} : memref<1x128x64xf32, #tpu.memory_space<vmem>>, vector<1x128x64xf32>,
    return
  }
  func.func @transform_0(%arg0: i32, %arg1: i32) -> (i32, i32, i32) {
    %c0_i32 = arith.constant 0 : i32
    %c0_i32_0 = arith.constant 0 : i32
    return %arg0, %c0_i32, %arg1 : i32, i32, i32
  }
  func.func @transform_1(%arg0: i32, %arg1: i32) -> (i32, i32) {
    %c0_i32 = arith.constant 0 : i32
    %c0_i32_0 = arith.constant 0 : i32
    %c0_i32_1 = arith.constant 0 : i32
    return %c0_i32, %c0_i32_0 : i32, i32
  }
  func.func @transform_2(%arg0: i32, %arg1: i32) -> (i32, i32) {
    %c0_i32 = arith.constant 0 : i32
    %c0_i32_0 = arith.constant 0 : i32
    %c0_i32_1 = arith.constant 0 : i32
    return %c0_i32, %c0_i32_0 : i32, i32
  }
  func.func @transform_3(%arg0: i32, %arg1: i32) -> (i32, i32) {
    %c0_i32 = arith.constant 0 : i32
    %c0_i32_0 = arith.constant 0 : i32
    %c0_i32_1 = arith.constant 0 : i32
    return %c0_i32, %c0_i32_0 : i32, i32
  }
  func.func @transform_4(%arg0: i32, %arg1: i32) -> (i32, i32) {
    %c0_i32 = arith.constant 0 : i32
    %c0_i32_0 = arith.constant 0 : i32
    %c0_i32_1 = arith.constant 0 : i32
    return %c0_i32, %c0_i32_0 : i32, i32
  }
  func.func @transform_5(%arg0: i32, %arg1: i32) -> (i32, i32) {
    %c0_i32 = arith.constant 0 : i32
    %c0_i32_0 = arith.constant 0 : i32
    %c0_i32_1 = arith.constant 0 : i32
    return %c0_i32, %c0_i32_0 : i32, i32
  }
  func.func @transform_6(%arg0: i32, %arg1: i32) -> (i32, i32) {
    %c0_i32 = arith.constant 0 : i32
    %c0_i32_0 = arith.constant 0 : i32
    %c0_i32_1 = arith.constant 0 : i32
    return %c0_i32, %c0_i32_0 : i32, i32
  }
  func.func @transform_7(%arg0: i32, %arg1: i32) -> (i32, i32, i32) {
    %c0_i32 = arith.constant 0 : i32
    %c0_i32_0 = arith.constant 0 : i32
    return %arg0, %c0_i32, %arg1 : i32, i32, i32
  }
}

</mosaic_0001>

<bundles_post_ra>
// kernel: tpu_custom_call.1
= control target key start
LH: loop header
LB: loop body
LE: loop exit
PB: predicated region body
PF: predicated region fallthrough
CT: control target
= control target key end

     0   :  { %s1504_s24 = smov 0   ;;  %s1506_s25 = smov 0   ;;  %s2247_s0 = inlined_call_operand.vmem [shape: f32[2,32,64], index: 0, kind: input, shape index: {}]   ;;  %s2248_s1 = inlined_call_operand.vmem [shape: f32[128,32], index: 1, kind: input, shape index: {}]   ;;  %s2249_s2 = inlined_call_operand.vmem [shape: f32[128,1], index: 2, kind: input, shape index: {}]   ;;  %s2250_s3 = inlined_call_operand.vmem [shape: f32[128,1], index: 3, kind: input, shape index: {}]   ;;  %s2251_s4 = inlined_call_operand.vmem [shape: f32[128,1], index: 4, kind: input, shape index: {}]   ;;  %s2252_s5 = inlined_call_operand.vmem [shape: f32[4,128], index: 5, kind: input, shape index: {}]   ;;  %s2253_s6 = inlined_call_operand.vmem [shape: f32[128,4], index: 6, kind: input, shape index: {}]   ;;  %s2254_s7 = inlined_call_operand.vmem [shape: f32[2,128,64], index: 7, kind: output, shape index: {}]  }
   0x1   :  { %s1508_s26 = smov 0  }
   0x2 LB: > { %s29_s27 = sadd.s32 1, %s1457_s25  ;;  %p1319_p0 = scmp.ge.s32.totalorder %s1461_s26, 1  ;;  %s1461_s26 = sphi %s1508_s26, %s17_s26   ;;  %s1457_s25 = sphi %s1506_s25, %s2266_s25   ;;  %s1453_s24 = sphi %s1504_s24, %s2265_s24  }
   0x3   : > { %p31_p1 = scmp.ge.s32.totalorder %s29_s27, 2  ;;  %p256_p2 = scmp.lt.s32.totalorder %s1461_s26, 3 }
   0x5   : > { %s2268_s27 = smov (%p31_p1, %s29_s27), 0  ;;  %p257_p3 = pnand %p1319_p0, %p256_p2 }
   0x6   : > { %p294_p4 = scmp.lt.s32.totalorder (!%p257_p3), %s1453_s24, 1 }
   0x7   : > { %260 = sbr.rel (%p257_p3) target bundleno = 1075 (0x433), region = 48 }
   0xc   : > { %v345_v0 = vld [vmem:[%s2249_s2 + $0x78] sm:$0xff]  ;;  %v343_v1 = vld [vmem:[%s2249_s2 + $0x68] sm:$0xff]  ;;  %v1463_v2 = vmov 0   ;;  %s2270_s24 = smov (!%p294_p4, %s1453_s24), 1  ;;  %v344_v6 = vld [vmem:[%s2249_s2 + $0x70] sm:$0xff]  ;;  %vm426_vm0 = vcmask 261120  }
   0xd   : > { %1404 = vset.pattern.permute.xlu0 %v1463_v2  ;;  %1405 = vset.pattern.permute.xlu1 %v1463_v2  ;;  %v341_v3 = vld [vmem:[%s2249_s2 + $0x58] sm:$0xff]  ;;  %s1376_s11 = sshll.u32 %s2270_s24, 5  ;;  %v342_v7 = vld [vmem:[%s2249_s2 + $0x60] sm:$0xff]  ;;  %v340_v9 = vld [vmem:[%s2249_s2 + $0x50] sm:$0xff]  ;;  %vm626_vm1 = vcmask 1043456   ;;  %vm577_vm2 = vcmask 31744  }
   0xe   : > { %423 = vperm.xlu0 %1404, %v345_v0   ;;  %413 = vperm.xlu1 %1405, %v343_v1   ;;  %s301_s14 = scalar_lea.vmem %s2247_s0, %s1376_s11  ;;  %v314_v11 = vld [vmem:[%s2248_s1] sm:$0xff]  ;;  %v339_v12 = vld [vmem:[%s2249_s2 + $0x48] sm:$0xff]  ;;  %v337_v14 = vld [vmem:[%s2249_s2 + $0x38] sm:$0xff]  ;;  %s1377_s19 = sshll.u32 %s2270_s24, 7  ;;  %vm1215_vm8 = vcmask 523264  }
   0xf   : > { %1406 = vset.pattern.permute.xlu2 %v1463_v2  ;;  %v313_v4 = vld [vmem:[%s301_s14 + $0x18] sm:$0xff]  ;;  %v312_v5 = vld [vmem:[%s301_s14 + $0x10] sm:$0xff]  ;;  %v311_v8 = vld [vmem:[%s301_s14 + $0x8] sm:$0xff]  ;;  %s2081_s24 = scalar_lea.vmem %s2254_s7, %s1377_s19 }
  0x10   : > { %403 = vperm.xlu2 %1406, %v341_v3   ;;  %487 = vmatpush.msra.mxu0 %v313_v4  ;;  %v310_v10 = vld [vmem:[%s301_s14] sm:$0xff]  ;;  %v315_v15 = vld [vmem:[%s2248_s1 + $0x8] sm:$0xff]  ;;  %v336_v16 = vld [vmem:[%s2249_s2 + $0x30] sm:$0xff] }
  0x11   : > { %v338_v13 = vld [vmem:[%s2249_s2 + $0x40] sm:$0xff]  ;;  %v335_v17 = vld [vmem:[%s2249_s2 + $0x28] sm:$0xff]  ;;  %v316_v19 = vld [vmem:[%s2248_s1 + $0x10] sm:$0xff] }
  0x12   : > { %488 = vmatpush.msra.mxu0 %v312_v5  ;;  %v334_v18 = vld [vmem:[%s2249_s2 + $0x20] sm:$0xff]  ;;  %v333_v20 = vld [vmem:[%s2249_s2 + $0x18] sm:$0xff]  ;;  %v332_v21 = vld [vmem:[%s2249_s2 + $0x10] sm:$0xff] }
  0x13   : > { %v331_v22 = vld [vmem:[%s2249_s2 + $0x8] sm:$0xff]  ;;  %v317_v23 = vld [vmem:[%s2248_s1 + $0x18] sm:$0xff]  ;;  %v330_v24 = vld [vmem:[%s2249_s2] sm:$0xff] }
  0x14   : > { %489 = vmatpush.msra.mxu0 %v311_v8  ;;  %v991_v25 = vld [vmem:[%s2250_s3] sm:$0xff]  ;;  %v992_v27 = vld [vmem:[%s2250_s3 + $0x8] sm:$0xff]  ;;  %v993_v28 = vld [vmem:[%s2250_s3 + $0x10] sm:$0xff] }
  0x15   : > { %v318_v26 = vld [vmem:[%s2248_s1 + $0x20] sm:$0xff]  ;;  %v994_v29 = vld [vmem:[%s2250_s3 + $0x18] sm:$0xff]  ;;  %v319_v30 = vld [vmem:[%s2248_s1 + $0x28] sm:$0xff] }
  0x16   : > { %418 = vperm.xlu0 %1404, %v344_v6   ;;  %408 = vperm.xlu1 %1405, %v342_v7   ;;  %v995_v31 = vld [vmem:[%s2250_s3 + $0x20] sm:$0xff]  ;;  %v996_v32 = vld [vmem:[%s2250_s3 + $0x28] sm:$0xff]  ;;  %v997_v33 = vld [vmem:[%s2250_s3 + $0x30] sm:$0xff] }
  0x17   : > { %490 = vmatpush.msra.mxu0 %v310_v10  ;;  %v320_v34 = vld [vmem:[%s2248_s1 + $0x30] sm:$0xff]  ;;  %v998_v35 = vld [vmem:[%s2250_s3 + $0x38] sm:$0xff]  ;;  %v999_v36 = vld [vmem:[%s2250_s3 + $0x40] sm:$0xff] }
  0x18   : > { %398 = vperm.xlu2 %1406, %v340_v9   ;;  %1324 = vmatmul.msk.f32.vlgmr.msra.gmra.mxu0 %vm426_vm0, %v314_v11  ;;  %v1000_v37 = vld [vmem:[%s2250_s3 + $0x48] sm:$0xff]  ;;  %v321_v38 = vld [vmem:[%s2248_s1 + $0x38] sm:$0xff]  ;;  %v1001_v39 = vld [vmem:[%s2250_s3 + $0x50] sm:$0xff] }
  0x19   : > { %v1002_v40 = vld [vmem:[%s2250_s3 + $0x58] sm:$0xff]  ;;  %v1003_v41 = vld [vmem:[%s2250_s3 + $0x60] sm:$0xff]  ;;  %v1005_v43 = vld [vmem:[%s2250_s3 + $0x70] sm:$0xff] }
  0x1a   : > { %v322_v42 = vld [vmem:[%s2248_s1 + $0x40] sm:$0xff]  ;;  %v1006_v44 = vld [vmem:[%s2250_s3 + $0x78] sm:$0xff]  ;;  %v323_v45 = vld [vmem:[%s2248_s1 + $0x48] sm:$0xff] }
  0x1b   : > { %v1004_v46 = vld [vmem:[%s2250_s3 + $0x68] sm:$0xff]  ;;  %v1105_v48 = vld [vmem:[%s2251_s4 + $0x10] sm:$0xff]  ;;  %v1103_v50 = vld [vmem:[%s2251_s4] sm:$0xff] }
  0x1c   : > { %v1104_v47 = vld [vmem:[%s2251_s4 + $0x8] sm:$0xff]  ;;  %v324_v49 = vld [vmem:[%s2248_s1 + $0x50] sm:$0xff]  ;;  %v1107_v51 = vld [vmem:[%s2251_s4 + $0x20] sm:$0xff] }
  0x1d   : > { %v1108_v52 = vld [vmem:[%s2251_s4 + $0x28] sm:$0xff]  ;;  %v325_v53 = vld [vmem:[%s2248_s1 + $0x58] sm:$0xff]  ;;  %v1111_v56 = vld [vmem:[%s2251_s4 + $0x40] sm:$0xff] }
  0x1e   : > { %393 = vperm.xlu0 %1404, %v339_v12   ;;  %388 = vperm.xlu1 %1405, %v338_v13   ;;  %v1106_v54 = vld [vmem:[%s2251_s4 + $0x18] sm:$0xff]  ;;  %v326_v57 = vld [vmem:[%s2248_s1 + $0x60] sm:$0xff]  ;;  %v1109_v58 = vld [vmem:[%s2251_s4 + $0x30] sm:$0xff] }
  0x1f   : > { %v1110_v55 = vld [vmem:[%s2251_s4 + $0x38] sm:$0xff]  ;;  %v1113_v59 = vld [vmem:[%s2251_s4 + $0x50] sm:$0xff]  ;;  %v327_v61 = vld [vmem:[%s2248_s1 + $0x68] sm:$0xff] }
  0x20   : > { %383 = vperm.xlu2 %1406, %v337_v14   ;;  %1325 = vmatmul.msk.f32.gmra.mxu0 %vm426_vm0, %v315_v15  ;;  %v1114_v60 = vld [vmem:[%s2251_s4 + $0x58] sm:$0xff]  ;;  %v1112_v62 = vld [vmem:[%s2251_s4 + $0x48] sm:$0xff]  ;;  %v1117_v0 = vld [vmem:[%s2251_s4 + $0x70] sm:$0xff] }
  0x21   : > { %v1116_v63 = vld [vmem:[%s2251_s4 + $0x68] sm:$0xff]  ;;  %v328_v1 = vld [vmem:[%s2248_s1 + $0x70] sm:$0xff]  ;;  %v1115_v2 = vld [vmem:[%s2251_s4 + $0x60] sm:$0xff] }
  0x22   : > { %v329_v3 = vld [vmem:[%s2248_s1 + $0x78] sm:$0xff] }
  0x23   : > { %v1118_v4 = vld [vmem:[%s2251_s4 + $0x78] sm:$0xff] }
  0x26   : > { %378 = vperm.xlu0 %1404, %v336_v16   ;;  %373 = vperm.xlu1 %1405, %v335_v17  }
  0x28   : > { %368 = vperm.xlu2 %1406, %v334_v18   ;;  %1326 = vmatmul.msk.f32.gmra.mxu0 %vm426_vm0, %v316_v19 }
  0x2e   : > { %363 = vperm.xlu0 %1404, %v333_v20   ;;  %358 = vperm.xlu1 %1405, %v332_v21  }
  0x30   : > { %353 = vperm.xlu2 %1406, %v331_v22   ;;  %1327 = vmatmul.msk.f32.gmra.mxu0 %vm426_vm0, %v317_v23 }
  0x36   : > { %348 = vperm.xlu0 %1404, %v330_v24   ;;  %1009 = vperm.xlu1 %1405, %v991_v25  }
  0x38   : > { %1328 = vmatmul.msk.f32.gmra.mxu0 %vm426_vm0, %v318_v26  ;;  %1014 = vperm.xlu2 %1406, %v992_v27  }
  0x3e   : > { %1019 = vperm.xlu0 %1404, %v993_v28   ;;  %1024 = vperm.xlu1 %1405, %v994_v29  }
  0x40   : > { %1329 = vmatmul.msk.f32.gmra.mxu0 %vm426_vm0, %v319_v30  ;;  %1029 = vperm.xlu2 %1406, %v995_v31  }
  0x46   : > { %1034 = vperm.xlu0 %1404, %v996_v32   ;;  %1039 = vperm.xlu1 %1405, %v997_v33  }
  0x48   : > { %1330 = vmatmul.msk.f32.gmra.mxu0 %vm426_vm0, %v320_v34  ;;  %1044 = vperm.xlu2 %1406, %v998_v35  }
  0x4e   : > { %1049 = vperm.xlu0 %1404, %v999_v36   ;;  %1054 = vperm.xlu1 %1405, %v1000_v37  }
  0x50   : > { %1331 = vmatmul.msk.f32.gmra.mxu0 %vm426_vm0, %v321_v38  ;;  %1059 = vperm.xlu2 %1406, %v1001_v39  }
  0x56   : > { %1064 = vperm.xlu0 %1404, %v1002_v40   ;;  %1069 = vperm.xlu1 %1405, %v1003_v41  }
  0x58   : > { %1332 = vmatmul.msk.f32.gmra.mxu0 %vm426_vm0, %v322_v42  ;;  %1074 = vperm.xlu2 %1406, %v1004_v46  }
  0x5e   : > { %1079 = vperm.xlu0 %1404, %v1005_v43   ;;  %1084 = vperm.xlu1 %1405, %v1006_v44  }
  0x60   : > { %1333 = vmatmul.msk.f32.gmra.mxu0 %vm426_vm0, %v323_v45  ;;  %1121 = vperm.xlu2 %1406, %v1103_v50  }
  0x66   : > { %1126 = vperm.xlu0 %1404, %v1104_v47   ;;  %1131 = vperm.xlu1 %1405, %v1105_v48  }
  0x68   : > { %1334 = vmatmul.msk.f32.gmra.mxu0 %vm426_vm0, %v324_v49  ;;  %1136 = vperm.xlu2 %1406, %v1106_v54   ;;  %v1793_v54 = vld [vmem:[%s2253_s6] sm:$0xff] }
  0x6a   : > { %v404_v21 = vpop.permute.xlu2 %403 }
  0x6e   : > { %1141 = vperm.xlu0 %1404, %v1107_v51   ;;  %1146 = vperm.xlu1 %1405, %v1108_v52  }
  0x70   : > { %1335 = vmatmul.msk.f32.gmra.mxu0 %vm426_vm0, %v325_v53  ;;  %1151 = vperm.xlu2 %1406, %v1109_v58   ;;  %v1786_v53 = vld [vmem:[%s2252_s5] sm:$0xf]  ;;  %v1815_v58 = vld [vmem:[%s2253_s6 + $0x18] sm:$0xff] }
  0x72   : > { %v399_v25 = vpop.permute.xlu2 %398 }
  0x76   : > { %1156 = vperm.xlu0 %1404, %v1110_v55   ;;  %1161 = vperm.xlu1 %1405, %v1111_v56   ;;  %v1801_v56 = vld [vmem:[%s2253_s6 + $0x8] sm:$0xff] }
  0x78   : > { %1336 = vmatmul.msk.f32.gmra.mxu0 %vm426_vm0, %v326_v57  ;;  %1166 = vperm.xlu2 %1406, %v1112_v62   ;;  %v1808_v57 = vld [vmem:[%s2253_s6 + $0x10] sm:$0xff]  ;;  %v1843_v62 = vld [vmem:[%s2253_s6 + $0x38] sm:$0xff] }
  0x7a   : > { %v384_v32 = vpop.permute.xlu2 %383 }
  0x7e   : > { %1171 = vperm.xlu0 %1404, %v1113_v59   ;;  %1176 = vperm.xlu1 %1405, %v1114_v60   ;;  %v1822_v59 = vld [vmem:[%s2253_s6 + $0x20] sm:$0xff]  ;;  %v1829_v60 = vld [vmem:[%s2253_s6 + $0x28] sm:$0xff] }
  0x80   : > { %1337 = vmatmul.msk.f32.gmra.mxu0 %vm426_vm0, %v327_v61  ;;  %1181 = vperm.xlu2 %1406, %v1115_v2   ;;  %v424_v18 = vpop.permute.xlu0 %423  ;;  %v414_v19 = vpop.permute.xlu1 %413  ;;  %v1836_v61 = vld [vmem:[%s2253_s6 + $0x30] sm:$0xff]  ;;  %v1871_v2 = vld [vmem:[%s2253_s6 + $0x58] sm:$0xff] }
  0x82   : > { %v369_v40 = vpop.permute.xlu2 %368 }
  0x86   : > { %1186 = vperm.xlu0 %1404, %v1116_v63   ;;  %1191 = vperm.xlu1 %1405, %v1117_v0   ;;  %v1850_v63 = vld [vmem:[%s2253_s6 + $0x40] sm:$0xff]  ;;  %v1857_v0 = vld [vmem:[%s2253_s6 + $0x48] sm:$0xff] }
  0x88   : > { %1338 = vmatmul.msk.f32.gmra.mxu0 %vm426_vm0, %v328_v1  ;;  %1196 = vperm.xlu2 %1406, %v1118_v4   ;;  %v419_v22 = vpop.permute.xlu0 %418  ;;  %v409_v24 = vpop.permute.xlu1 %408  ;;  %v1864_v1 = vld [vmem:[%s2253_s6 + $0x50] sm:$0xff]  ;;  %v1885_v4 = vld [vmem:[%s2253_s6 + $0x68] sm:$0xff] }
  0x8a   : > { %v354_v48 = vpop.permute.xlu2 %353 }
  0x90   : > { %1339 = vmatmul.msk.f32.gmra.mxu0 %vm426_vm0, %v329_v3  ;;  %v394_v26 = vpop.permute.xlu0 %393  ;;  %v389_v30 = vpop.permute.xlu1 %388  ;;  %v1878_v3 = vld [vmem:[%s2253_s6 + $0x60] sm:$0xff] }
  0x95   : > { %v492_v5 = vpop.f32.mrf.mxu0 }
  0x98   : > { %v379_v34 = vpop.permute.xlu0 %378  ;;  %v374_v38 = vpop.permute.xlu1 %373 }
  0x9d   : > { %v495_v6 = vpop.f32.mrf.mxu0 }
  0x9e   : > { %v1777_v51 = vadd.f32 %v495_v6, %v354_v48  ;;  %v1899_v6 = vld [vmem:[%s2253_s6 + $0x78] sm:$0xff] }
  0xa0   : > { %v364_v42 = vpop.permute.xlu0 %363  ;;  %v359_v46 = vpop.permute.xlu1 %358 }
  0xa5   : > { %v498_v7 = vpop.f32.mrf.mxu0 }
  0xa6   : > { %v1774_v49 = vadd.f32 %v498_v7, %v359_v46 }
  0xa8   : > { %v349_v50 = vpop.permute.xlu0 %348 }
  0xa9   : > { %v1780_v52 = vadd.f32 %v492_v5, %v349_v50  ;;  %v1892_v5 = vld [vmem:[%s2253_s6 + $0x70] sm:$0xff] }
  0xad   : > { %v501_v8 = vpop.f32.mrf.mxu0 }
  0xae   : > { %v1771_v47 = vadd.f32 %v501_v8, %v364_v42 }
  0xb5   : > { %v504_v9 = vpop.f32.mrf.mxu0 }
  0xb6   : > { %v1768_v45 = vadd.f32 %v504_v9, %v369_v40 }
  0xbd   : > { %v507_v10 = vpop.f32.mrf.mxu0 }
  0xbe   : > { %v1765_v44 = vadd.f32 %v507_v10, %v374_v38 }
  0xc5   : > { %v510_v11 = vpop.f32.mrf.mxu0 }
  0xc6   : > { %v1762_v43 = vadd.f32 %v510_v11, %v379_v34 }
  0xcd   : > { %v513_v12 = vpop.f32.mrf.mxu0 }
  0xce   : > { %v1759_v41 = vadd.f32 %v513_v12, %v384_v32 }
  0xd5   : > { %v516_v13 = vpop.f32.mrf.mxu0 }
  0xd6   : > { %v1756_v39 = vadd.f32 %v516_v13, %v389_v30 }
  0xdd   : > { %v519_v14 = vpop.f32.mrf.mxu0 }
  0xde   : > { %v1753_v37 = vadd.f32 %v519_v14, %v394_v26 }
  0xe5   : > { %v522_v15 = vpop.f32.mrf.mxu0 }
  0xe6   : > { %v1750_v36 = vadd.f32 %v522_v15, %v399_v25 }
  0xed   : > { %v525_v16 = vpop.f32.mrf.mxu0 }
  0xee   : > { %v1747_v35 = vadd.f32 %v525_v16, %v404_v21 }
  0xf5   : > { %v528_v17 = vpop.f32.mrf.mxu0 }
  0xf6   : > { %v1744_v33 = vadd.f32 %v528_v17, %v409_v24 }
  0xfd   : > { %v531_v20 = vpop.f32.mrf.mxu0 }
  0xfe   : > { %v1741_v31 = vadd.f32 %v531_v20, %v414_v19 }
 0x105   : > { %v534_v23 = vpop.f32.mrf.mxu0 }
 0x106   : > { %v1738_v29 = vadd.f32 %v534_v23, %v419_v22 }
 0x10d   : > { %v537_v27 = vpop.f32.mrf.mxu0 }
 0x10e   : > { %v1736_v28 = vadd.f32 %v537_v27, %v424_v18 }
 0x110   : > { %557 = vmatpush.msra.mxu1 %v1736_v28 }
 0x112   : > { %558 = vmatpush.msra.mxu1 %v1738_v29 }
 0x114   : > { %559 = vmatpush.msra.mxu1 %v1741_v31 }
 0x116   : > { %560 = vmatpush.msra.mxu1 %v1744_v33 }
 0x118   : > { %561 = vmatpush.msra.mxu1 %v1747_v35 }
 0x11a   : > { %562 = vmatpush.msra.mxu1 %v1750_v36 }
 0x11c   : > { %563 = vmatpush.msra.mxu1 %v1753_v37 }
 0x11e   : > { %564 = vmatpush.msra.mxu1 %v1756_v39 }
 0x120   : > { %565 = vmatpush.msra.mxu1 %v1759_v41 }
 0x122   : > { %566 = vmatpush.msra.mxu1 %v1762_v43 }
 0x124   : > { %567 = vmatpush.msra.mxu1 %v1765_v44 }
 0x126   : > { %568 = vmatpush.msra.mxu1 %v1768_v45 }
 0x128   : > { %569 = vmatpush.msra.mxu1 %v1771_v47 }
 0x12a   : > { %570 = vmatpush.msra.mxu1 %v1774_v49 }
 0x12c   : > { %571 = vmatpush.msra.mxu1 %v1777_v51 }
 0x12e   : > { %572 = vmatpush.msra.mxu1 %v1780_v52 }
 0x12f   : > { %573 = vmatmul.f32.vlgmr.msra.gmra.mxu1 %v1786_v53 }
 0x1ac   : > { %v574_v55 = vpop.f32.mrf.mxu1 }
 0x1ad   : > { %1340 = vmatpush.msk.msra.mxu2 %vm626_vm1, %v574_v55 }
 0x1ae   : > { %1341 = vmatmul.msk.f32.vlgmr.msra.gmra.mxu2 %vm577_vm2, %v1793_v54 }
 0x1b6   : > { %1342 = vmatmul.msk.f32.gmra.mxu2 %vm577_vm2, %v1801_v56 }
 0x1be   : > { %1343 = vmatmul.msk.f32.gmra.mxu2 %vm577_vm2, %v1808_v57 }
 0x1c6   : > { %1344 = vmatmul.msk.f32.gmra.mxu2 %vm577_vm2, %v1815_v58 }
 0x1ce   : > { %1345 = vmatmul.msk.f32.gmra.mxu2 %vm577_vm2, %v1822_v59 }
 0x1d6   : > { %1346 = vmatmul.msk.f32.gmra.mxu2 %vm577_vm2, %v1829_v60 }
 0x1de   : > { %1347 = vmatmul.msk.f32.gmra.mxu2 %vm577_vm2, %v1836_v61 }
 0x1e6   : > { %1348 = vmatmul.msk.f32.gmra.mxu2 %vm577_vm2, %v1843_v62 }
 0x1ee   : > { %1349 = vmatmul.msk.f32.gmra.mxu2 %vm577_vm2, %v1850_v63 }
 0x1f6   : > { %1350 = vmatmul.msk.f32.gmra.mxu2 %vm577_vm2, %v1857_v0 }
 0x1fe   : > { %1351 = vmatmul.msk.f32.gmra.mxu2 %vm577_vm2, %v1864_v1 }
 0x206   : > { %1352 = vmatmul.msk.f32.gmra.mxu2 %vm577_vm2, %v1871_v2 }
 0x20e   : > { %1353 = vmatmul.msk.f32.gmra.mxu2 %vm577_vm2, %v1878_v3 }
 0x216   : > { %1354 = vmatmul.msk.f32.gmra.mxu2 %vm577_vm2, %v1885_v4 }
 0x21e   : > { %1355 = vmatmul.msk.f32.gmra.mxu2 %vm577_vm2, %v1892_v5 }
 0x226   : > { %1356 = vmatmul.msk.f32.gmra.mxu2 %vm577_vm2, %v1899_v6 }
 0x231   : > { %v647_v7 = vpop.f32.mrf.mxu2 }
 0x239   : > { %v650_v8 = vpop.f32.mrf.mxu2 }
 0x241   : > { %v653_v9 = vpop.f32.mrf.mxu2 }
 0x249   : > { %v656_v10 = vpop.f32.mrf.mxu2 }
 0x251   : > { %v659_v11 = vpop.f32.mrf.mxu2 }
 0x259   : > { %v662_v12 = vpop.f32.mrf.mxu2 }
 0x261   : > { %v665_v13 = vpop.f32.mrf.mxu2 }
 0x269   : > { %v668_v14 = vpop.f32.mrf.mxu2 }
 0x271   : > { %v671_v15 = vpop.f32.mrf.mxu2 }
 0x279   : > { %v674_v16 = vpop.f32.mrf.mxu2 }
 0x281   : > { %v677_v17 = vpop.f32.mrf.mxu2 }
 0x289   : > { %v680_v18 = vpop.f32.mrf.mxu2 }
 0x28a   : > { %v1920_v32 = vsub.f32 %v1747_v35, %v680_v18  ;;  %v1935_v35 = vsub.f32 %v1756_v39, %v671_v15  ;;  %v1950_v39 = vsub.f32 %v1765_v44, %v662_v12  ;;  %v1965_v44 = vsub.f32 %v1774_v49, %v653_v9 }
 0x28c   : > { %v722_v34 = vmul.f32 %v1920_v32, %v1920_v32  ;;  %v719_v42 = vmul.f32 %v1935_v35, %v1935_v35  ;;  %v716_v50 = vmul.f32 %v1950_v39, %v1950_v39 }
 0x291   : > { %v683_v19 = vpop.f32.mrf.mxu2 }
 0x292   : > { %v1915_v27 = vsub.f32 %v1744_v33, %v683_v19  ;;  %v1930_v33 = vsub.f32 %v1753_v37, %v674_v16  ;;  %v1945_v37 = vsub.f32 %v1762_v43, %v665_v13  ;;  %v1960_v43 = vsub.f32 %v1771_v47, %v656_v10 }
 0x293   : > { %v1975_v47 = vsub.f32 %v1780_v52, %v647_v7  ;;  %v713_v10 = vmul.f32 %v1965_v44, %v1965_v44  ;;  %v2018_v52 = vpop.permute.xlu1 %1009 }
 0x294   : > { %v720_v40 = vmul.f32 %v1930_v33, %v1930_v33  ;;  %v717_v48 = vmul.f32 %v1945_v37, %v1945_v37 }
 0x299   : > { %v686_v20 = vpop.f32.mrf.mxu2 }
 0x29a   : > { %v1910_v25 = vsub.f32 %v1741_v31, %v686_v20  ;;  %v723_v31 = vmul.f32 %v1915_v27, %v1915_v27 }
 0x2a1   : > { %v689_v21 = vpop.f32.mrf.mxu2 }
 0x2a2   : > { %v1904_v23 = vsub.f32 %v1738_v29, %v689_v21  ;;  %v1925_v29 = vsub.f32 %v1750_v36, %v677_v17  ;;  %v1940_v36 = vsub.f32 %v1759_v41, %v668_v14  ;;  %v1955_v41 = vsub.f32 %v1768_v45, %v659_v11 }
 0x2a3   : > { %v1970_v45 = vsub.f32 %v1777_v51, %v650_v8  ;;  %v714_v11 = vmul.f32 %v1960_v43, %v1960_v43  ;;  %v711_v51 = vmul.f32 %v1975_v47, %v1975_v47 }
 0x2a4   : > { %v725_v30 = vmul.f32 %v1904_v23, %v1904_v23  ;;  %v721_v38 = vmul.f32 %v1925_v29, %v1925_v29  ;;  %v718_v46 = vmul.f32 %v1940_v36, %v1940_v36  ;;  %v715_v55 = vmul.f32 %v1955_v41, %v1955_v41 }
 0x2a5   : > { %v712_v49 = vmul.f32 %v1970_v45, %v1970_v45 }
 0x2a9   : > { %v692_v22 = vpop.f32.mrf.mxu2 }
 0x2aa   : > { %v1907_v24 = vsub.f32 %v1736_v28, %v692_v22  ;;  %v724_v28 = vmul.f32 %v1910_v25, %v1910_v25 }
 0x2ac   : > { %v726_v26 = vmul.f32 %v1907_v24, %v1907_v24 }
 0x2ae   : > { %727 = vmatpush.msra.mxu3 %v726_v26 }
 0x2b0   : > { %728 = vmatpush.msra.mxu3 %v725_v30 }
 0x2b2   : > { %729 = vmatpush.msra.mxu3 %v724_v28 }
 0x2b4   : > { %730 = vmatpush.msra.mxu3 %v723_v31 }
 0x2b6   : > { %731 = vmatpush.msra.mxu3 %v722_v34 }
 0x2b8   : > { %732 = vmatpush.msra.mxu3 %v721_v38 }
 0x2ba   : > { %733 = vmatpush.msra.mxu3 %v720_v40 }
 0x2bc   : > { %734 = vmatpush.msra.mxu3 %v719_v42 }
 0x2be   : > { %735 = vmatpush.msra.mxu3 %v718_v46 }
 0x2c0   : > { %736 = vmatpush.msra.mxu3 %v717_v48 }
 0x2c2   : > { %737 = vmatpush.msra.mxu3 %v716_v50 }
 0x2c4   : > { %738 = vmatpush.msra.mxu3 %v715_v55 }
 0x2c6   : > { %739 = vmatpush.msra.mxu3 %v714_v11 }
 0x2c8   : > { %740 = vmatpush.msra.mxu3 %v713_v10 }
 0x2ca   : > { %741 = vmatpush.msra.mxu3 %v712_v49 }
 0x2cc   : > { %742 = vmatpush.msra.mxu3 %v711_v51 }
 0x2cd   : > { %743 = vmatmul.f32.vlgmr.msra.gmra.mxu3 %v1786_v53  ;;  %v2020_v53 = vpop.permute.xlu0 %1019 }
 0x350   : > { %v744_v8 = vpop.f32.mrf.mxu3 }
 0x351   : > { %1357 = vmatpush.msk.msrb.mxu1 %vm626_vm1, %v744_v8  ;;  %1378 = vmatpush.msk.msrb.mxu3 %vm626_vm1, %v744_v8 }
 0x352   : > { %1358 = vmatmul.msk.f32.vlgmr.msrb.gmra.mxu1 %vm577_vm2, %v1793_v54  ;;  %1368 = vmatmul.msk.f32.vlgmr.msrb.gmra.mxu3 %vm577_vm2, %v1864_v1  ;;  %v2022_v54 = vpop.permute.xlu2 %1014 }
 0x35a   : > { %1359 = vmatmul.msk.f32.gmra.mxu1 %vm577_vm2, %v1801_v56  ;;  %1369 = vmatmul.msk.f32.gmra.mxu3 %vm577_vm2, %v1871_v2  ;;  %v2024_v56 = vpop.permute.xlu1 %1024 }
 0x362   : > { %1360 = vmatmul.msk.f32.gmra.mxu1 %vm577_vm2, %v1808_v57  ;;  %1370 = vmatmul.msk.f32.gmra.mxu3 %vm577_vm2, %v1878_v3  ;;  %v2026_v57 = vpop.permute.xlu0 %1034 }
 0x36a   : > { %1361 = vmatmul.msk.f32.gmra.mxu1 %vm577_vm2, %v1815_v58  ;;  %1371 = vmatmul.msk.f32.gmra.mxu3 %vm577_vm2, %v1885_v4  ;;  %v2028_v58 = vpop.permute.xlu2 %1029 }
 0x372   : > { %1362 = vmatmul.msk.f32.gmra.mxu1 %vm577_vm2, %v1822_v59  ;;  %1372 = vmatmul.msk.f32.gmra.mxu3 %vm577_vm2, %v1892_v5  ;;  %v2030_v59 = vpop.permute.xlu1 %1039 }
 0x37a   : > { %1363 = vmatmul.msk.f32.gmra.mxu1 %vm577_vm2, %v1829_v60  ;;  %1373 = vmatmul.msk.f32.gmra.mxu3 %vm577_vm2, %v1899_v6  ;;  %v2032_v60 = vpop.permute.xlu0 %1049 }
 0x382   : > { %1364 = vmatmul.msk.f32.gmra.mxu1 %vm577_vm2, %v1836_v61  ;;  %v2034_v61 = vpop.permute.xlu2 %1044 }
 0x38a   : > { %1365 = vmatmul.msk.f32.gmra.mxu1 %vm577_vm2, %v1843_v62  ;;  %v2036_v62 = vpop.permute.xlu1 %1054 }
 0x392   : > { %1366 = vmatmul.msk.f32.gmra.mxu1 %vm577_vm2, %v1850_v63  ;;  %v2038_v63 = vpop.permute.xlu0 %1064  ;;  %v2042_v1 = vpop.permute.xlu1 %1069 }
 0x39a   : > { %1367 = vmatmul.msk.f32.gmra.mxu1 %vm577_vm2, %v1857_v0  ;;  %v2040_v0 = vpop.permute.xlu2 %1059  ;;  %v2044_v2 = vpop.permute.xlu0 %1079 }
 0x39b   : > { %v2048_v4 = vpop.permute.xlu1 %1084 }
 0x3a2   : > { %v2046_v3 = vpop.permute.xlu2 %1074  ;;  %v2050_v5 = vpop.permute.xlu0 %1126 }
 0x3a3   : > { %v2052_v14 = vpop.permute.xlu1 %1131 }
 0x3aa   : > { %v1122_v9 = vpop.permute.xlu2 %1121  ;;  %v2054_v18 = vpop.permute.xlu0 %1141 }
 0x3ab   : > { %v2063_v46 = vpop.permute.xlu1 %1146 }
 0x3b2   : > { %v2058_v28 = vpop.permute.xlu2 %1136  ;;  %v2066_v11 = vpop.permute.xlu0 %1156 }
 0x3cf   : > { %v767_v6 = vpop.f32.mrf.mxu1 }
 0x3d0   : > { %v768_v7 = vadd.f32 1e-05, %v767_v6 }
 0x3d2   : > { %1407 = vrsqrt.f32 %v768_v7  ;;  %vm821_vm4 = vweird.f32 %v768_v7 }
 0x3d5   : > { %v797_v12 = vpop.f32.mrf.mxu3 }
 0x3d6   : > { %v798_v13 = vadd.f32 1e-05, %v797_v12 }
 0x3d7   : > { %v770_v15 = vpop.f32.mrf.mxu1 }
 0x3d8   : > { %v1408_v16 = vpop.eup %1407  ;;  %1409 = vrsqrt.f32 %v798_v13  ;;  %v771_v17 = vadd.f32 1e-05, %v770_v15  ;;  %vm921_vm6 = vweird.f32 %v798_v13 }
 0x3d9   : > { %v816_v19 = vmul.f32 %v1408_v16, %v768_v7  ;;  %vm822_vm3 = vweird.f32 %v1408_v16 }
 0x3da   : > { %1411 = vrsqrt.f32 %v771_v17  ;;  %vm823_vm5 = vmor %vm821_vm4, %vm822_vm3  ;;  %vm831_vm11 = vweird.f32 %v771_v17 }
 0x3db   : > { %v817_v20 = vmul.f32 %v1408_v16, %v816_v19 }
 0x3dd   : > { %v818_v21 = vmul.f32 0.5, %v817_v20  ;;  %v800_v22 = vpop.f32.mrf.mxu3 }
 0x3de   : > { %v1410_v26 = vpop.eup %1409  ;;  %v2056_v30 = vadd.f32 1e-05, %v800_v22 }
 0x3df   : > { %v819_v31 = vsub.f32 1.5, %v818_v21  ;;  %v916_v34 = vmul.f32 %v1410_v26, %v798_v13  ;;  %v773_v38 = vpop.f32.mrf.mxu1  ;;  %vm922_vm7 = vweird.f32 %v1410_v26 }
 0x3e0   : > { %v1412_v40 = vpop.eup %1411  ;;  %1413 = vrsqrt.f32 %v2056_v30  ;;  %v2061_v42 = vadd.f32 1e-05, %v773_v38  ;;  %vm2072_vm9 = vmor %vm921_vm6, %vm922_vm7  ;;  %v2087_v38 = vpop.permute.xlu2 %1151  ;;  %vm931_vm13 = vweird.f32 %v2056_v30 }
 0x3e1   : > { %v820_v48 = vmul.f32 %v1408_v16, %v819_v31  ;;  %v917_v50 = vmul.f32 %v1410_v26, %v916_v34  ;;  %v826_v55 = vmul.f32 %v1412_v40, %v771_v17  ;;  %vm832_vm10 = vweird.f32 %v1412_v40 }
 0x3e2   : > { %1415 = vrsqrt.f32 %v2061_v42  ;;  %vm833_vm12 = vmor %vm831_vm11, %vm832_vm10  ;;  %vm841_vm1 = vweird.f32 %v2061_v42 }
 0x3e3   : > { %v824_v10 = vsel %vm823_vm5, %v1408_v16, %v820_v48  ;;  %v918_v49 = vmul.f32 0.5, %v917_v50  ;;  %v827_v51 = vmul.f32 %v1412_v40, %v826_v55 }
 0x3e4   : > { %v975_v8 = vmul.f32 %v824_v10, %v1975_v47 }
 0x3e5   : > { %v919_v6 = vsub.f32 1.5, %v918_v49  ;;  %v828_v12 = vmul.f32 0.5, %v827_v51  ;;  %v803_v15 = vpop.f32.mrf.mxu3 }
 0x3e6   : > { %v1414_v19 = vpop.eup %1413  ;;  %v1087_v7 = vmul.f32 %v2018_v52, %v975_v8  ;;  %v2076_v21 = vadd.f32 1e-05, %v803_v15 }
 0x3e7   : > { %v920_v47 = vmul.f32 %v1410_v26, %v919_v6  ;;  %v829_v16 = vsub.f32 1.5, %v828_v12  ;;  %v926_v22 = vmul.f32 %v1414_v19, %v2056_v30  ;;  %v776_v52 = vpop.f32.mrf.mxu1  ;;  %vm932_vm14 = vweird.f32 %v1414_v19  ;;  %v1172_v12 = vpop.permute.xlu0 %1171 }
 0x3e8   : > { %v1416_v31 = vpop.eup %1415  ;;  %v1199_v13 = vadd.f32 %v1122_v9, %v1087_v7  ;;  %1417 = vrsqrt.f32 %v2076_v21  ;;  %v2085_v34 = vadd.f32 1e-05, %v776_v52  ;;  %v2098_v9 = vpop.permute.xlu1 %1161  ;;  %vm2105_vm15 = vmor %vm931_vm13, %vm932_vm14  ;;  %vm941_vm3 = vweird.f32 %v2076_v21 }
 0x3e9   : > { %v924_v48 = vsel %vm2072_vm9, %v1410_v26, %v920_v47  ;;  %v830_v50 = vmul.f32 %v1412_v40, %v829_v16  ;;  %v927_v55 = vmul.f32 %v1414_v19, %v926_v22  ;;  %v836_v10 = vmul.f32 %v1416_v31, %v2061_v42 }
 0x3ea   : > { %1216 = vst.msk [vmem:[%s2081_s24] sm:$0xff] %vm1215_vm8, %v1199_v13  ;;  %v985_v49 = vmul.f32 %v924_v48, %v1925_v29  ;;  %1419 = vrsqrt.f32 %v2085_v34  ;;  %vm842_vm0 = vweird.f32 %v1416_v31  ;;  %vm851_vm7 = vweird.f32 %v2085_v34 }
 0x3eb   : > { %v834_v17 = vsel %vm833_vm12, %v1412_v40, %v830_v50  ;;  %v928_v51 = vmul.f32 0.5, %v927_v55  ;;  %v837_v26 = vmul.f32 %v1416_v31, %v836_v10  ;;  %vm843_vm2 = vmor %vm841_vm1, %vm842_vm0 }
 0x3ec   : > { %v1097_v8 = vmul.f32 %v2040_v0, %v985_v49  ;;  %v976_v6 = vmul.f32 %v834_v17, %v1970_v45 }
 0x3ed   : > { %v929_v15 = vsub.f32 1.5, %v928_v51  ;;  %v838_v29 = vmul.f32 0.5, %v837_v26  ;;  %v806_v7 = vpop.f32.mrf.mxu3 }
 0x3ee   : > { %v1418_v20 = vpop.eup %1417  ;;  %v1209_v47 = vadd.f32 %v1172_v12, %v1097_v8  ;;  %v1088_v16 = vmul.f32 %v2022_v54, %v976_v6  ;;  %v2109_v22 = vadd.f32 1e-05, %v806_v7 }
 0x3ef   : > { %v930_v0 = vmul.f32 %v1414_v19, %v929_v15  ;;  %v839_v45 = vsub.f32 1.5, %v838_v29  ;;  %v936_v52 = vmul.f32 %v1418_v20, %v2076_v21  ;;  %v779_v13 = vpop.f32.mrf.mxu1  ;;  %vm942_vm4 = vweird.f32 %v1418_v20 }
 0x3f0   : > { %v1420_v48 = vpop.eup %1419  ;;  %1226 = vst.msk [vmem:[%s2081_s24 + $0x50] sm:$0xff] %vm1215_vm8, %v1209_v47  ;;  %v1200_v54 = vadd.f32 %v2050_v5, %v1088_v16  ;;  %1421 = vrsqrt.f32 %v2109_v22  ;;  %v2117_v30 = vadd.f32 1e-05, %v779_v13  ;;  %v2128_v5 = vpop.permute.xlu2 %1166  ;;  %vm2135_vm5 = vmor %vm941_vm3, %vm942_vm4  ;;  %vm951_vm10 = vweird.f32 %v2109_v22 }
 0x3f1   : > { %v934_v50 = vsel %vm2105_vm15, %v1414_v19, %v930_v0  ;;  %v840_v55 = vmul.f32 %v1416_v31, %v839_v45  ;;  %v937_v10 = vmul.f32 %v1418_v20, %v936_v52  ;;  %v846_v49 = vmul.f32 %v1420_v48, %v2085_v34  ;;  %v1177_v6 = vpop.permute.xlu1 %1176 }
 0x3f2   : > { %1217 = vst.msk [vmem:[%s2081_s24 + $0x8] sm:$0xff] %vm1215_vm8, %v1200_v54  ;;  %v986_v17 = vmul.f32 %v934_v50, %v1920_v32  ;;  %1423 = vrsqrt.f32 %v2117_v30  ;;  %vm852_vm6 = vweird.f32 %v1420_v48  ;;  %vm861_vm14 = vweird.f32 %v2117_v30 }
 0x3f3   : > { %v844_v42 = vsel %vm843_vm2, %v1416_v31, %v840_v55  ;;  %v938_v51 = vmul.f32 0.5, %v937_v10  ;;  %v847_v19 = vmul.f32 %v1420_v48, %v846_v49  ;;  %vm853_vm9 = vmor %vm851_vm7, %vm852_vm6 }
 0x3f4   : > { %v1098_v26 = vmul.f32 %v2038_v63, %v986_v17  ;;  %v977_v8 = vmul.f32 %v844_v42, %v1965_v44 }
 0x3f5   : > { %v939_v12 = vsub.f32 1.5, %v938_v51  ;;  %v848_v32 = vmul.f32 0.5, %v847_v19  ;;  %v809_v15 = vpop.f32.mrf.mxu3 }
 0x3f6   : > { %v1422_v29 = vpop.eup %1421  ;;  %v1210_v7 = vadd.f32 %v1177_v6, %v1098_v26  ;;  %v1089_v47 = vmul.f32 %v2020_v53, %v977_v8  ;;  %v2139_v16 = vadd.f32 1e-05, %v809_v15 }
 0x3f7   : > { %v940_v63 = vmul.f32 %v1418_v20, %v939_v12  ;;  %v849_v44 = vsub.f32 1.5, %v848_v32  ;;  %v946_v40 = vmul.f32 %v1422_v29, %v2109_v22  ;;  %v782_v0 = vpop.f32.mrf.mxu1  ;;  %vm952_vm11 = vweird.f32 %v1422_v29 }
 0x3f8   : > { %v1424_v45 = vpop.eup %1423  ;;  %1227 = vst.msk [vmem:[%s2081_s24 + $0x58] sm:$0xff] %vm1215_vm8, %v1210_v7  ;;  %v1201_v53 = vadd.f32 %v2052_v14, %v1089_v47  ;;  %1425 = vrsqrt.f32 %v2139_v16  ;;  %v2147_v21 = vadd.f32 1e-05, %v782_v0  ;;  %v1182_v17 = vpop.permute.xlu2 %1181  ;;  %vm2163_vm12 = vmor %vm951_vm10, %vm952_vm11  ;;  %vm961_vm0 = vweird.f32 %v2139_v16 }
 0x3f9   : > { %v944_v52 = vsel %vm2135_vm5, %v1418_v20, %v940_v63  ;;  %v850_v13 = vmul.f32 %v1420_v48, %v849_v44  ;;  %v947_v54 = vmul.f32 %v1422_v29, %v946_v40  ;;  %v856_v50 = vmul.f32 %v1424_v45, %v2117_v30 }
 0x3fa   : > { %1218 = vst.msk [vmem:[%s2081_s24 + $0x10] sm:$0xff] %vm1215_vm8, %v1201_v53  ;;  %v987_v55 = vmul.f32 %v944_v52, %v1915_v27  ;;  %1427 = vrsqrt.f32 %v2147_v21  ;;  %vm862_vm13 = vweird.f32 %v1424_v45  ;;  %v1187_v53 = vpop.permute.xlu0 %1186  ;;  %vm871_vm4 = vweird.f32 %v2147_v21 }
 0x3fb   : > { %v854_v14 = vsel %vm853_vm9, %v1420_v48, %v850_v13  ;;  %v948_v34 = vmul.f32 0.5, %v947_v54  ;;  %v857_v10 = vmul.f32 %v1424_v45, %v856_v50  ;;  %vm863_vm15 = vmor %vm861_vm14, %vm862_vm13 }
 0x3fc   : > { %v1099_v20 = vmul.f32 %v2042_v1, %v987_v55  ;;  %v978_v49 = vmul.f32 %v854_v14, %v1960_v43 }
 0x3fd   : > { %v949_v42 = vsub.f32 1.5, %v948_v34  ;;  %v858_v51 = vmul.f32 0.5, %v857_v10  ;;  %v812_v19 = vpop.f32.mrf.mxu3 }
 0x3fe   : > { %v1426_v27 = vpop.eup %1425  ;;  %v1211_v26 = vadd.f32 %v1182_v17, %v1099_v20  ;;  %v1090_v8 = vmul.f32 %v2024_v56, %v978_v49  ;;  %v2167_v6 = vadd.f32 1e-05, %v812_v19 }
 0x3ff   : > { %v950_v1 = vmul.f32 %v1422_v29, %v949_v42  ;;  %v859_v43 = vsub.f32 1.5, %v858_v51  ;;  %v956_v12 = vmul.f32 %v1426_v27, %v2139_v16  ;;  %v785_v32 = vpop.f32.mrf.mxu1  ;;  %vm962_vm1 = vweird.f32 %v1426_v27 }
 0x400   : > { %v1428_v15 = vpop.eup %1427  ;;  %1228 = vst.msk [vmem:[%s2081_s24 + $0x60] sm:$0xff] %vm1215_vm8, %v1211_v26  ;;  %v1202_v56 = vadd.f32 %v2058_v28, %v1090_v8  ;;  %1429 = vrsqrt.f32 %v2167_v6  ;;  %v2175_v22 = vadd.f32 1e-05, %v785_v32  ;;  %vm2189_vm2 = vmor %vm961_vm0, %vm962_vm1  ;;  %vm971_vm6 = vweird.f32 %v2167_v6  ;;  %v1192_v26 = vpop.permute.xlu1 %1191 }
 0x401   : > { %v954_v7 = vsel %vm2163_vm12, %v1422_v29, %v950_v1  ;;  %v860_v47 = vmul.f32 %v1424_v45, %v859_v43  ;;  %v957_v31 = vmul.f32 %v1426_v27, %v956_v12  ;;  %v866_v63 = vmul.f32 %v1428_v15, %v2147_v21 }
 0x402   : > { %1219 = vst.msk [vmem:[%s2081_s24 + $0x18] sm:$0xff] %vm1215_vm8, %v1202_v56  ;;  %v988_v44 = vmul.f32 %v954_v7, %v1910_v25  ;;  %1431 = vrsqrt.f32 %v2175_v22  ;;  %vm872_vm3 = vweird.f32 %v1428_v15  ;;  %vm881_vm11 = vweird.f32 %v2175_v22 }
 0x403   : > { %v864_v28 = vsel %vm863_vm15, %v1424_v45, %v860_v47  ;;  %v958_v30 = vmul.f32 0.5, %v957_v31  ;;  %v867_v40 = vmul.f32 %v1428_v15, %v866_v63  ;;  %vm873_vm5 = vmor %vm871_vm4, %vm872_vm3 }
 0x404   : > { %v1100_v29 = vmul.f32 %v2046_v3, %v988_v44  ;;  %v979_v0 = vmul.f32 %v864_v28, %v1955_v41  ;;  %v1197_v44 = vpop.permute.xlu2 %1196 }
 0x405   : > { %v959_v52 = vsub.f32 1.5, %v958_v30  ;;  %v868_v13 = vmul.f32 0.5, %v867_v40 }
 0x406   : > { %v1430_v54 = vpop.eup %1429  ;;  %v1212_v25 = vadd.f32 %v1187_v53, %v1100_v29  ;;  %v1091_v50 = vmul.f32 %v2028_v58, %v979_v0 }
 0x407   : > { %v960_v45 = vmul.f32 %v1426_v27, %v959_v52  ;;  %v869_v55 = vsub.f32 1.5, %v868_v13  ;;  %v966_v14 = vmul.f32 %v1430_v54, %v2167_v6  ;;  %v788_v3 = vpop.f32.mrf.mxu1  ;;  %vm972_vm7 = vweird.f32 %v1430_v54 }
 0x408   : > { %v1432_v34 = vpop.eup %1431  ;;  %1229 = vst.msk [vmem:[%s2081_s24 + $0x68] sm:$0xff] %vm1215_vm8, %v1212_v25  ;;  %v1203_v41 = vadd.f32 %v2054_v18, %v1091_v50  ;;  %v789_v10 = vadd.f32 1e-05, %v788_v3  ;;  %vm973_vm9 = vmor %vm971_vm6, %vm972_vm7 }
 0x409   : > { %v964_v58 = vsel %vm2189_vm2, %v1426_v27, %v960_v45  ;;  %v870_v20 = vmul.f32 %v1428_v15, %v869_v55  ;;  %v967_v49 = vmul.f32 %v1430_v54, %v966_v14  ;;  %v876_v17 = vmul.f32 %v1432_v34, %v2175_v22 }
 0x40a   : > { %1220 = vst.msk [vmem:[%s2081_s24 + $0x20] sm:$0xff] %vm1215_vm8, %v1203_v41  ;;  %v989_v42 = vmul.f32 %v964_v58, %v1904_v23  ;;  %1433 = vrsqrt.f32 %v789_v10  ;;  %vm882_vm10 = vweird.f32 %v1432_v34  ;;  %vm891_vm14 = vweird.f32 %v789_v10 }
 0x40b   : > { %v874_v51 = vsel %vm873_vm5, %v1428_v15, %v870_v20  ;;  %v968_v18 = vmul.f32 0.5, %v967_v49  ;;  %v877_v21 = vmul.f32 %v1432_v34, %v876_v17  ;;  %vm883_vm12 = vmor %vm881_vm11, %vm882_vm10 }
 0x40c   : > { %v1101_v19 = vmul.f32 %v2044_v2, %v989_v42  ;;  %v980_v27 = vmul.f32 %v874_v51, %v1950_v39 }
 0x40d   : > { %v969_v8 = vsub.f32 1.5, %v968_v18  ;;  %v878_v48 = vmul.f32 0.5, %v877_v21 }
 0x40e   : > { %v1213_v1 = vadd.f32 %v1192_v26, %v1101_v19  ;;  %v1092_v23 = vmul.f32 %v2026_v57, %v980_v27 }
 0x40f   : > { %v970_v43 = vmul.f32 %v1430_v54, %v969_v8  ;;  %v879_v6 = vsub.f32 1.5, %v878_v48  ;;  %v791_v12 = vpop.f32.mrf.mxu1 }
 0x410   : > { %v1434_v32 = vpop.eup %1433  ;;  %1230 = vst.msk [vmem:[%s2081_s24 + $0x70] sm:$0xff] %vm1215_vm8, %v1213_v1  ;;  %v1204_v15 = vadd.f32 %v2063_v46, %v1092_v23  ;;  %v792_v2 = vadd.f32 1e-05, %v791_v12 }
 0x411   : > { %v974_v56 = vsel %vm973_vm9, %v1430_v54, %v970_v43  ;;  %v880_v39 = vmul.f32 %v1432_v34, %v879_v6  ;;  %v886_v7 = vmul.f32 %v1434_v32, %v789_v10  ;;  %vm892_vm13 = vweird.f32 %v1434_v32 }
 0x412   : > { %1221 = vst.msk [vmem:[%s2081_s24 + $0x28] sm:$0xff] %vm1215_vm8, %v1204_v15  ;;  %v990_v57 = vmul.f32 %v974_v56, %v1907_v24  ;;  %1435 = vrsqrt.f32 %v792_v2  ;;  %vm893_vm15 = vmor %vm891_vm14, %vm892_vm13  ;;  %vm901_vm1 = vweird.f32 %v792_v2 }
 0x413   : > { %v884_v47 = vsel %vm883_vm12, %v1432_v34, %v880_v39  ;;  %v887_v31 = vmul.f32 %v1434_v32, %v886_v7 }
 0x414   : > { %v1102_v63 = vmul.f32 %v2048_v4, %v990_v57  ;;  %v981_v46 = vmul.f32 %v884_v47, %v1945_v37 }
 0x415   : > { %v888_v28 = vmul.f32 0.5, %v887_v31 }
 0x416   : > { %v1214_v30 = vadd.f32 %v1197_v44, %v1102_v63  ;;  %v1093_v22 = vmul.f32 %v2030_v59, %v981_v46 }
 0x417   : > { %v889_v40 = vsub.f32 1.5, %v888_v28  ;;  %v794_v29 = vpop.f32.mrf.mxu1 }
 0x418   : > { %v1436_v0 = vpop.eup %1435  ;;  %1231 = vst.msk [vmem:[%s2081_s24 + $0x78] sm:$0xff] %vm1215_vm8, %v1214_v30  ;;  %v1205_v24 = vadd.f32 %v2087_v38, %v1093_v22  ;;  %v795_v53 = vadd.f32 1e-05, %v794_v29 }
 0x419   : > { %v890_v52 = vmul.f32 %v1434_v32, %v889_v40  ;;  %v896_v4 = vmul.f32 %v1436_v0, %v792_v2  ;;  %vm902_vm0 = vweird.f32 %v1436_v0 }
 0x41a   : > { %1222 = vst.msk [vmem:[%s2081_s24 + $0x30] sm:$0xff] %vm1215_vm8, %v1205_v24  ;;  %1437 = vrsqrt.f32 %v795_v53  ;;  %vm903_vm2 = vmor %vm901_vm1, %vm902_vm0  ;;  %vm911_vm4 = vweird.f32 %v795_v53 }
 0x41b   : > { %v894_v37 = vsel %vm893_vm15, %v1434_v32, %v890_v52  ;;  %v897_v13 = vmul.f32 %v1436_v0, %v896_v4 }
 0x41c   : > { %v982_v59 = vmul.f32 %v894_v37, %v1940_v36 }
 0x41d   : > { %v898_v54 = vmul.f32 0.5, %v897_v13 }
 0x41e   : > { %v1094_v25 = vmul.f32 %v2034_v61, %v982_v59 }
 0x41f   : > { %v899_v50 = vsub.f32 1.5, %v898_v54 }
 0x420   : > { %v1438_v16 = vpop.eup %1437  ;;  %v1206_v38 = vadd.f32 %v2066_v11, %v1094_v25 }
 0x421   : > { %v900_v45 = vmul.f32 %v1436_v0, %v899_v50  ;;  %v906_v55 = vmul.f32 %v1438_v16, %v795_v53  ;;  %vm912_vm3 = vweird.f32 %v1438_v16 }
 0x422   : > { %1223 = vst.msk [vmem:[%s2081_s24 + $0x38] sm:$0xff] %vm1215_vm8, %v1206_v38  ;;  %vm913_vm5 = vmor %vm911_vm4, %vm912_vm3 }
 0x423   : > { %v904_v14 = vsel %vm903_vm2, %v1436_v0, %v900_v45  ;;  %v907_v3 = vmul.f32 %v1438_v16, %v906_v55 }
 0x424   : > { %v983_v36 = vmul.f32 %v904_v14, %v1935_v35 }
 0x425   : > { %v908_v34 = vmul.f32 0.5, %v907_v3 }
 0x426   : > { %v1095_v61 = vmul.f32 %v2032_v60, %v983_v36 }
 0x427   : > { %v909_v41 = vsub.f32 1.5, %v908_v34 }
 0x428   : > { %v1207_v10 = vadd.f32 %v2098_v9, %v1095_v61 }
 0x429   : > { %v910_v11 = vmul.f32 %v1438_v16, %v909_v41 }
 0x42a   : > { %1224 = vst.msk [vmem:[%s2081_s24 + $0x40] sm:$0xff] %vm1215_vm8, %v1207_v10 }
 0x42b   : > { %v914_v58 = vsel %vm913_vm5, %v1438_v16, %v910_v11 }
 0x42c   : > { %v984_v20 = vmul.f32 %v914_v58, %v1930_v33 }
 0x42e   : > { %v1096_v49 = vmul.f32 %v2036_v62, %v984_v20 }
 0x430   : > { %v1208_v17 = vadd.f32 %v2128_v5, %v1096_v49 }
 0x432   : > { %1225 = vst.msk [vmem:[%s2081_s24 + $0x48] sm:$0xff] %vm1215_vm8, %v1208_v17 }
 0x433 PF: > { %s17_s26 = sadd.s32 1, %s1461_s26   ;;  %s2265_s24 = smov %s1457_s25 }
 0x434   : > { %p14_p5 = scmp.ge.s32.totalorder %s17_s26, 4   ;;  %s2266_s25 = smov %s2268_s27 }
 0x436   :  { %16 = sbr.rel (!%p14_p5) target bundleno = 2 (0x2), region = 78 }

</bundles_post_ra>
